<compile_context>
chip_gen: v7x
topology: tpu7x:2x2x1
jax: 0.10.0
libtpu: 0.0.40
codegen_flags: <defaults>
</compile_context>

<pallas_src>
from functools import partial

import jax
import jax.numpy as jnp
from jax.experimental import pallas as pl
from jax.experimental.pallas import tpu as pltpu


def soft_threshold_kernel(x_ref, t_ref, o_ref):
    # x_ref / o_ref: VMEM (br, bc); t_ref: VMEM (br, 1) per-row threshold.
    x = x_ref[...]
    t = t_ref[...]  # (br, 1) -> broadcasts across the lane dimension on the VPU
    zero = jnp.zeros_like(x)
    pos = jnp.where(x > t, x - t, zero)
    neg = jnp.where(x < -t, x + t, zero)
    o_ref[...] = pos + neg


def _select_blocks(rows, cols, itemsize, target_tile_bytes):
    """Pick (br, bc) for a (rows, cols) lane-dense problem.

    cols is already a multiple of 128 (wrapper pads). Prefers full-width
    column blocks; guarantees >=2 blocks on a parallel axis when possible
    (v7x megacore).
    """
    lane = 128
    sub = max(8, 32 // itemsize)  # sublane multiple: f32->8, bf16->16, int8->32
    max_elems = max(target_tile_bytes // itemsize, sub * lane)

    if cols <= max_elems:
        # Full-width tiles: one contiguous HBM region per DMA.
        bc = cols
        cap = max(sub, (max_elems // cols) // sub * sub)
        br = rows if rows <= cap else cap
    else:
        # Pathologically wide rows: split the lane axis as a last resort.
        br = rows if rows <= sub else sub
        bc = max(lane, min(cols, (max_elems // max(br, 1)) // lane * lane))

    # v7x has 2 TensorCores: make sure a "parallel" axis has >= 2 blocks.
    if br == rows and bc == cols:
        if rows >= 2 * sub:
            br = max(sub, (rows // 2) // sub * sub)
        elif cols >= 2 * lane:
            bc = max(lane, (cols // 2) // lane * lane)
    return br, bc


@partial(jax.jit, static_argnames=("target_tile_bytes",))
def soft_threshold(x, threshold, *, target_tile_bytes=2 * 1024 * 1024):
    """x: (N, C, H, W); threshold: (1, C, 1, 1). Matches SoftThreshold.forward."""
    N, C, H, W = x.shape
    rows, cols = N * C, H * W
    itemsize = jnp.dtype(x.dtype).itemsize

    # Flatten to a lane-dense 2D problem.
    x2 = x.reshape(rows, cols)

    # Pad the lane (column) dim to a multiple of 128 -> unmasked full-lane
    # stores and lane-dense DMAs (no-op for the common 128-multiple H*W).
    lane = 128
    pcols = ((cols + lane - 1) // lane) * lane
    if pcols != cols:
        x2 = jnp.pad(x2, ((0, 0), (0, pcols - cols)))

    # Per-row threshold column: row r = n*C + c -> threshold[c]. Tiny; fused
    # under jit.
    thr_rows = jnp.tile(threshold.reshape(C).astype(x.dtype), N).reshape(rows, 1)

    br, bc = _select_blocks(rows, pcols, itemsize, target_tile_bytes)
    grid = (pl.cdiv(rows, br), pl.cdiv(pcols, bc))

    out2 = pl.pallas_call(
        soft_threshold_kernel,
        out_shape=jax.ShapeDtypeStruct((rows, pcols), x.dtype),
        grid=grid,
        in_specs=[
            pl.BlockSpec((br, bc), lambda i, j: (i, j)),
            pl.BlockSpec((br, 1), lambda i, j: (i, 0)),
        ],
        out_specs=pl.BlockSpec((br, bc), lambda i, j: (i, j)),
        compiler_params=pltpu.CompilerParams(
            dimension_semantics=("parallel", "parallel")
        ),
    )(x2, thr_rows)

    if pcols != cols:
        out2 = out2[:, :cols]
    return out2.reshape(N, C, H, W)


def soft_threshold_ref(x, threshold):
    mask1 = (x > threshold).astype(x.dtype)
    mask2 = (x < -threshold).astype(x.dtype)
    return mask1 * (x - threshold) + mask2 * (x + threshold)


if __name__ == "__main__":
    N, C, H, W = 2, 4, 16, 16
    init_threshold = 0.001

    key = jax.random.PRNGKey(0)
    x = jax.random.normal(key, (N, C, H, W), dtype=jnp.float32) * 0.01

    # Deterministic parameter init, same as nn.Parameter(init_threshold * ones(1, C, 1, 1)).
    threshold = init_threshold * jnp.ones((1, C, 1, 1), dtype=jnp.float32)

    out = soft_threshold(x, threshold)
    out = jax.block_until_ready(out)

    ref = soft_threshold_ref(x, threshold)
    assert out.shape == (N, C, H, W)
    assert jnp.allclose(out, ref, atol=1e-6), "mismatch vs reference"

    print("KERNEL_OK")
</pallas_src>

<mosaic_0001>
module attributes {stable_mosaic.version = 11 : i64} {
  func.func @soft_threshold_kernel(%arg0: i32, %arg1: i32, %arg2: memref<8x128xf32, #tpu.memory_space<vmem>>, %arg3: memref<8x1xf32, #tpu.memory_space<vmem>>, %arg4: memref<8x128xf32, #tpu.memory_space<vmem>>) attributes {dimension_semantics = [#tpu.dimension_semantics<parallel>, #tpu.dimension_semantics<parallel>], iteration_bounds = array<i64: 1, 2>, scalar_prefetch = 0 : i64, scratch_operands = 0 : i64, tpu.core_type = #tpu.core_type<tc>, window_params = [{transform_indices = @transform_0, window_bounds = array<i64: 8, 128>}, {transform_indices = @transform_1, window_bounds = array<i64: 8, 1>}, {transform_indices = @transform_2, window_bounds = array<i64: 8, 128>}]} {
    %c0 = arith.constant 0 : index
    %c0_0 = arith.constant 0 : index
    %0 = vector.load %arg2[%c0, %c0_0] : memref<8x128xf32, #tpu.memory_space<vmem>>, vector<8x128xf32>
    %c0_1 = arith.constant 0 : index
    %c0_2 = arith.constant 0 : index
    %1 = vector.load %arg3[%c0_1, %c0_2] : memref<8x1xf32, #tpu.memory_space<vmem>>, vector<8x1xf32>
    %cst = arith.constant 0.000000e+00 : f32
    %2 = vector.broadcast %cst : f32 to vector<8x128xf32>
    %3 = vector.broadcast %1 : vector<8x1xf32> to vector<8x128xf32>
    %4 = arith.cmpf ogt, %0, %3 : vector<8x128xf32>
    %5 = vector.broadcast %1 : vector<8x1xf32> to vector<8x128xf32>
    %6 = arith.subf %0, %5 : vector<8x128xf32>
    %7 = arith.select %4, %6, %2 : vector<8x128xi1>, vector<8x128xf32>
    %cst_3 = arith.constant 0.000000e+00 : f32
    %8 = vector.broadcast %cst_3 : f32 to vector<8x1xf32>
    %9 = arith.subf %8, %1 : vector<8x1xf32>
    %10 = vector.broadcast %9 : vector<8x1xf32> to vector<8x128xf32>
    %11 = arith.cmpf olt, %0, %10 : vector<8x128xf32>
    %12 = vector.broadcast %1 : vector<8x1xf32> to vector<8x128xf32>
    %13 = arith.addf %0, %12 : vector<8x128xf32>
    %14 = arith.select %11, %13, %2 : vector<8x128xi1>, vector<8x128xf32>
    %15 = arith.addf %7, %14 : vector<8x128xf32>
    %c0_4 = arith.constant 0 : index
    %c0_5 = arith.constant 0 : index
    %16 = vector.load %arg4[%c0_4, %c0_5] : memref<8x128xf32, #tpu.memory_space<vmem>>, vector<8x128xf32>
    tpu.vector_store %arg4[%c0_4, %c0_5], %15 {strides = array<i32>} : memref<8x128xf32, #tpu.memory_space<vmem>>, vector<8x128xf32>,
    return
  }
  func.func @transform_0(%arg0: i32, %arg1: i32) -> (i32, i32) {
    %c0_i32 = arith.constant 0 : i32
    return %arg0, %arg1 : i32, i32
  }
  func.func @transform_1(%arg0: i32, %arg1: i32) -> (i32, i32) {
    %c0_i32 = arith.constant 0 : i32
    %c0_i32_0 = arith.constant 0 : i32
    return %arg0, %c0_i32 : i32, i32
  }
  func.func @transform_2(%arg0: i32, %arg1: i32) -> (i32, i32) {
    %c0_i32 = arith.constant 0 : i32
    return %arg0, %arg1 : i32, i32
  }
}

</mosaic_0001>

<bundles_post_ra>
// kernel: tile.6
= control target key start
LH: loop header
LB: loop body
LE: loop exit
PB: predicated region body
PF: predicated region fallthrough
CT: control target
= control target key end

     0   :  { %s22_s0 = inlined_call_operand.vmem [shape: f32[4], index: 0, kind: input, shape index: {}]   ;;  %s23_s1 = inlined_call_operand.vmem [shape: f32[2,4], index: 1, kind: output, shape index: {}]  }
   0x1   :  { %v4_v0 = vld [vmem:[%s22_s0] ss:$0 sm:$0xff] }
   0x2   :  { %5 = vst [vmem:[%s23_s1] sm:$0x3] %v4_v0 }

// kernel: tile.0
= control target key start
LH: loop header
LB: loop body
LE: loop exit
PB: predicated region body
PF: predicated region fallthrough
CT: control target
= control target key end

     0   :  { %s34_s8 = smov 125   ;;  %vm7_vm0 = vcmask 7168   ;;  %s35_s11 = smov 126   ;;  %s61_s0 = inlined_call_operand.vmem [shape: f32[2,4], index: 0, kind: input, shape index: {}]   ;;  %s62_s1 = inlined_call_operand.vmem [shape: f32[8,1], index: 1, kind: output, shape index: {}]  }
   0x1   :  { %v4_v0 = vld [vmem:[%s61_s0] sm:$0x3]  ;;  %s33_s0 = smov 127  }
   0x2   :  { %5 = vst [vmem:[#allocation0] sm:$0x3] %v4_v0 }
   0x9   :  { %v9_v1 = vld [vmem:[#allocation0] sm:$0x3]  }
   0xa   :  { %v21_v2 = vld [vmem:[#allocation0] sm:$0x3]   ;;  %10 = vrot.lane.b32.xlu0 %v9_v1, %s33_s0 }
   0xb   :  { %22 = vrot.lane.b32.xlu1 %v21_v2, %s34_s8  ;;  %v6_v3 = vld [vmem:[#allocation0] sm:$0x3]  }
   0xc   :  { %v15_v4 = vld [vmem:[#allocation0] sm:$0x3]   ;;  %8 = vst.msk [vmem:[%s62_s1] ss:$4 sm:$0x3] %vm7_vm0, %v6_v3  }
   0xe   :  { %16 = vrot.lane.b32.xlu0 %v15_v4, %s35_s11 }
  0x7c   :  { %v11_v5 = vpop.permute.xlu0 %10  }
  0x7d   :  { %v23_v6 = vpop.permute.xlu1 %22   ;;  %27 = vst.msk [vmem:[%s62_s1 + $0x1] ss:$4 sm:$0x3] %vm7_vm0, %v11_v5  }
  0x7e   :  { %29 = vst.msk [vmem:[%s62_s1 + $0x3] ss:$4 sm:$0x3] %vm7_vm0, %v23_v6  }
  0x80   :  { %v17_v7 = vpop.permute.xlu0 %16  }
  0x81   :  { %28 = vst.msk [vmem:[%s62_s1 + $0x2] ss:$4 sm:$0x3] %vm7_vm0, %v17_v7  }

// kernel: soft_threshold.1
= control target key start
LH: loop header
LB: loop body
LE: loop exit
PB: predicated region body
PF: predicated region fallthrough
CT: control target
= control target key end

     0   :  { %s388_s9 = smov 0   ;;  %s390_s10 = smov 0   ;;  %s421_s0 = inlined_call_operand.vmem [shape: f32[8,256], index: 0, kind: input, shape index: {}]   ;;  %s422_s1 = inlined_call_operand.vmem [shape: f32[8,1], index: 1, kind: input, shape index: {}]   ;;  %s423_s2 = inlined_call_operand.vmem [shape: f32[8,256], index: 2, kind: output, shape index: {}]  }
   0x1   :  { %s392_s11 = smov 0  }
   0x2 LB: > { %s21_s12 = sadd.s32 1, %s366_s10  ;;  %p317_p0 = scmp.ge.s32.totalorder %s370_s11, 1  ;;  %s370_s11 = sphi %s392_s11, %s12_s11   ;;  %s366_s10 = sphi %s390_s10, %s425_s10   ;;  %s362_s9 = sphi %s388_s9, %s424_s9  }
   0x3   : > { %p22_p1 = scmp.ge.s32.totalorder %s21_s12, 2  ;;  %p140_p2 = scmp.lt.s32.totalorder %s370_s11, 3 }
   0x5   : > { %s427_s12 = smov (%p22_p1, %s21_s12), 0  ;;  %p141_p3 = pnand %p317_p0, %p140_p2 }
   0x6   : > { %v193_v0 = vld [vmem:[%s422_s1] sm:$0xff] (!%p141_p3)  ;;  %v372_v1 = vmov (!%p141_p3), 0   ;;  %p174_p4 = scmp.lt.s32.totalorder (!%p141_p3), %s362_s9, 1 }
   0x7   : > { %144 = sbr.rel (%p141_p3) target bundleno = 145 (0x91), region = 28  ;;  %347 = vset.pattern.permute.xlu0 (!%p141_p3), %v372_v1  ;;  %v202_v2 = vsub.f32 (!%p141_p3), 0.0, %v193_v0 }
   0x8   : > { %196 = vperm.xlu0 (!%p141_p3), %347, %v193_v0  }
   0xc   : > { %205 = vperm.xlu0 (!%p141_p3), %347, %v202_v2  }
   0xe   : > { %s429_s9 = smov (!%p174_p4, %s362_s9), 1 }
   0xf   : > { %s318_s15 = sshll.u32 %s429_s9, 3 }
  0x10   : > { %s179_s18 = scalar_lea.vmem %s421_s0, %s318_s15  ;;  %s191_s21 = scalar_lea.vmem %s423_s2, %s318_s15 }
  0x11   : > { %v192_v3 = vld [vmem:[%s179_s18] sm:$0xff] }
  0x87   : > { %v197_v4 = vpop.permute.xlu0 %196 }
  0x88   : > { %v200_v5 = vsub.f32 %v192_v3, %v197_v4  ;;  %vm199_vm0 = vcmp.gt.f32.partialorder %v192_v3, %v197_v4  ;;  %v209_v7 = vadd.f32 %v197_v4, %v192_v3 }
  0x8a   : > { %v201_v8 = vsel %vm199_vm0, %v200_v5, 0.0 }
  0x8b   : > { %v206_v6 = vpop.permute.xlu0 %205 }
  0x8c   : > { %vm208_vm1 = vcmp.lt.f32.partialorder %v192_v3, %v206_v6 }
  0x8d   : > { %v210_v9 = vsel %vm208_vm1, %v209_v7, 0.0 }
  0x8e   : > { %v211_v10 = vadd.f32 %v210_v9, %v201_v8 }
  0x90   : > { %212 = vst [vmem:[%s191_s21] sm:$0xff] %v211_v10 }
  0x91 PF: > { %s12_s11 = sadd.s32 1, %s370_s11   ;;  %s424_s9 = smov %s366_s10 }
  0x92   : > { %p9_p5 = scmp.ge.s32.totalorder %s12_s11, 4   ;;  %s425_s10 = smov %s427_s12 }
  0x94   :  { %11 = sbr.rel (!%p9_p5) target bundleno = 2 (0x2), region = 61 }

</bundles_post_ra>
